<compile_context>
chip_gen: v7x
topology: tpu7x:2x2x1
jax: 0.10.0
libtpu: 0.0.40
codegen_flags: <defaults>
</compile_context>

<pallas_src>
import jax
import jax.numpy as jnp
from jax.experimental import pallas as pl
from jax.experimental.pallas import tpu as pltpu


def _round_up(n, m):
    return ((n + m - 1) // m) * m


def attention_kernel(x_ref, w1_ref, b1_ref, w2_ref, b2_ref, o_ref):
    # Full hot path in-kernel: 2 matmuls (MXU), relu/sigmoid/mul (VPU/EUP).
    x = x_ref[...].astype(jnp.float32)
    h = jnp.dot(x, w1_ref[...], preferred_element_type=jnp.float32) + b1_ref[...]
    h = jnp.maximum(h, 0.0)                                   # ReLU
    a = jnp.dot(h, w2_ref[...], preferred_element_type=jnp.float32) + b2_ref[...]
    a = jax.nn.sigmoid(a)                                     # sigmoid gate
    o_ref[...] = (a * x).astype(o_ref.dtype)


def attention_forward(x, w1, b1, w2, b2, *, block_rows=1024):
    """Gated-MLP attention.

    x : (B, F)    w1 : (F, I)    b1 : (1, I)    w2 : (I, F)    b2 : (1, F)
    `block_rows` = packed (128-lane) rows per grid step.
    """
    B, F = x.shape
    I = w1.shape[1]

    # ---- lane-dense packing factor ------------------------------------
    pack = 128 // F if (F < 128 and 128 % F == 0) else 1
    Fp = F * pack          # packed feature width (=128 when F divides 128)
    Ip = I * pack          # packed hidden width

    if pack > 1:
        # Block-diagonal weights / tiled biases (host-side, ~160 KiB, resident).
        eye = jnp.eye(pack, dtype=w1.dtype)
        w1_p = jnp.kron(eye, w1)             # (Fp, Ip), block-diag of W1
        w2_p = jnp.kron(eye, w2)             # (Ip, Fp), block-diag of W2
        b1_p = jnp.tile(b1, (1, pack))       # (1, Ip)
        b2_p = jnp.tile(b2, (1, pack))       # (1, Fp)
    else:
        w1_p, w2_p, b1_p, b2_p = w1, w2, b1, b2

    # ---- pad batch so packed rows tile cleanly ------------------------
    Bp = -(-B // pack)                        # packed rows needed
    Bp = _round_up(Bp, 8)                     # sublane alignment
    block_m = max(8, min(block_rows, Bp))
    block_m = (block_m // 8) * 8              # keep multiple of 8
    Bp = _round_up(Bp, block_m)               # every grid tile is full
    B_pad = Bp * pack

    x_in = x if B_pad == B else jnp.pad(x, ((0, B_pad - B), (0, 0)))
    xp = x_in.reshape(Bp, Fp)                 # contiguous row-major repack

    grid = (Bp // block_m,)

    out_p = pl.pallas_call(
        attention_kernel,
        out_shape=jax.ShapeDtypeStruct((Bp, Fp), x.dtype),
        grid_spec=pltpu.PrefetchScalarGridSpec(
            num_scalar_prefetch=0,
            grid=grid,
            in_specs=[
                pl.BlockSpec((block_m, Fp), lambda i: (i, 0)),   # packed x tile
                pl.BlockSpec((Fp, Ip), lambda i: (0, 0)),         # W1 (resident)
                pl.BlockSpec((1, Ip), lambda i: (0, 0)),          # b1
                pl.BlockSpec((Ip, Fp), lambda i: (0, 0)),         # W2 (resident)
                pl.BlockSpec((1, Fp), lambda i: (0, 0)),          # b2
            ],
            out_specs=pl.BlockSpec((block_m, Fp), lambda i: (i, 0)),
        ),
        compiler_params=pltpu.CompilerParams(
            # Parallel grid axis -> shards across TensorCores on v7x.
            dimension_semantics=("parallel",),
        ),
    )(xp, w1_p, b1_p, w2_p, b2_p)

    out = out_p.reshape(B_pad, F)
    return out[:B] if B_pad != B else out


def attention_ref(x, w1, b1, w2, b2):
    h = jnp.maximum(x @ w1 + b1, 0.0)
    a = jax.nn.sigmoid(h @ w2 + b2)
    return a * x


if __name__ == "__main__":
    key = jax.random.PRNGKey(0)
    feature_dim = 32
    intermediate_dim = 64
    batch = 72   # not a multiple of the 32-row packing group -> exercises padding

    kx, k1, k2, k3, k4 = jax.random.split(key, 5)

    # Deterministic synthetic parameters (nn.Linear-shaped, pre-transposed).
    x = jax.random.normal(kx, (batch, feature_dim), dtype=jnp.float32)
    # attention_fc: Linear(feature_dim -> intermediate_dim)
    w1 = jax.random.normal(k1, (feature_dim, intermediate_dim), jnp.float32) * 0.1
    b1 = jax.random.normal(k2, (1, intermediate_dim), jnp.float32) * 0.1
    # output_fc: Linear(intermediate_dim -> feature_dim)
    w2 = jax.random.normal(k3, (intermediate_dim, feature_dim), jnp.float32) * 0.1
    b2 = jax.random.normal(k4, (1, feature_dim), jnp.float32) * 0.1

    ref = attention_ref(x, w1, b1, w2, b2)

    # Default (large-block) path: single grid step at this tiny demo size.
    out = attention_forward(x, w1, b1, w2, b2)
    out = jax.block_until_ready(out)
    assert out.shape == x.shape and out.dtype == x.dtype
    assert jnp.allclose(out, ref, atol=1e-5, rtol=1e-5), "mismatch (default block)"

    # Small-block path: multi-step parallel grid + batch padding exercised.
    out_multi = attention_forward(x, w1, b1, w2, b2, block_rows=8)
    out_multi = jax.block_until_ready(out_multi)
    assert jnp.allclose(out_multi, ref, atol=1e-5, rtol=1e-5), "mismatch (multi-step)"

    print("KERNEL_OK")
</pallas_src>

<mosaic_0001>
module attributes {stable_mosaic.version = 11 : i64} {
  func.func @attention_kernel(%arg0: i32, %arg1: memref<24x128xf32, #tpu.memory_space<vmem>>, %arg2: memref<128x256xf32, #tpu.memory_space<vmem>>, %arg3: memref<1x256xf32, #tpu.memory_space<vmem>>, %arg4: memref<256x128xf32, #tpu.memory_space<vmem>>, %arg5: memref<1x128xf32, #tpu.memory_space<vmem>>, %arg6: memref<24x128xf32, #tpu.memory_space<vmem>>) attributes {dimension_semantics = [#tpu.dimension_semantics<parallel>], iteration_bounds = array<i64: 1>, scalar_prefetch = 0 : i64, scratch_operands = 0 : i64, tpu.core_type = #tpu.core_type<tc>, window_params = [{transform_indices = @transform_0, window_bounds = array<i64: 24, 128>}, {pipeline_mode = #tpu.pipeline_mode<synchronous>, transform_indices = @transform_1, window_bounds = array<i64: 128, 256>}, {pipeline_mode = #tpu.pipeline_mode<synchronous>, transform_indices = @transform_2, window_bounds = array<i64: 1, 256>}, {pipeline_mode = #tpu.pipeline_mode<synchronous>, transform_indices = @transform_3, window_bounds = array<i64: 256, 128>}, {pipeline_mode = #tpu.pipeline_mode<synchronous>, transform_indices = @transform_4, window_bounds = array<i64: 1, 128>}, {transform_indices = @transform_5, window_bounds = array<i64: 24, 128>}]} {
    %c0 = arith.constant 0 : index
    %c0_0 = arith.constant 0 : index
    %0 = vector.load %arg1[%c0, %c0_0] : memref<24x128xf32, #tpu.memory_space<vmem>>, vector<24x128xf32>
    %c0_1 = arith.constant 0 : index
    %c0_2 = arith.constant 0 : index
    %1 = vector.load %arg2[%c0_1, %c0_2] : memref<128x256xf32, #tpu.memory_space<vmem>>, vector<128x256xf32>
    %cst = arith.constant dense<0.000000e+00> : vector<24x256xf32>
    %2 = tpu.matmul %0, %1, %cst {dimension_numbers = #tpu.dot_dimension_numbers<[1], [0], [0], [1], [0, 0, 1, 1], [], []>} : vector<24x128xf32>, vector<128x256xf32>, vector<24x256xf32> -> vector<24x256xf32>
    %c0_3 = arith.constant 0 : index
    %c0_4 = arith.constant 0 : index
    %3 = vector.load %arg3[%c0_3, %c0_4] : memref<1x256xf32, #tpu.memory_space<vmem>>, vector<1x256xf32>
    %4 = vector.broadcast %3 : vector<1x256xf32> to vector<24x256xf32>
    %5 = arith.addf %2, %4 : vector<24x256xf32>
    %cst_5 = arith.constant 0.000000e+00 : f32
    %6 = vector.broadcast %cst_5 : f32 to vector<24x256xf32>
    %7 = arith.maximumf %5, %6 : vector<24x256xf32>
    %c0_6 = arith.constant 0 : index
    %c0_7 = arith.constant 0 : index
    %8 = vector.load %arg4[%c0_6, %c0_7] : memref<256x128xf32, #tpu.memory_space<vmem>>, vector<256x128xf32>
    %cst_8 = arith.constant dense<0.000000e+00> : vector<24x128xf32>
    %9 = tpu.matmul %7, %8, %cst_8 {dimension_numbers = #tpu.dot_dimension_numbers<[1], [0], [0], [1], [0, 0, 1, 1], [], []>} : vector<24x256xf32>, vector<256x128xf32>, vector<24x128xf32> -> vector<24x128xf32>
    %c0_9 = arith.constant 0 : index
    %c0_10 = arith.constant 0 : index
    %10 = vector.load %arg5[%c0_9, %c0_10] : memref<1x128xf32, #tpu.memory_space<vmem>>, vector<1x128xf32>
    %11 = vector.broadcast %10 : vector<1x128xf32> to vector<24x128xf32>
    %12 = arith.addf %9, %11 : vector<24x128xf32>
    %13 = arith.negf %12 : vector<24x128xf32>
    %14 = math.exp %13 : vector<24x128xf32>
    %cst_11 = arith.constant 1.000000e+00 : f32
    %15 = vector.broadcast %cst_11 : f32 to vector<24x128xf32>
    %16 = arith.addf %15, %14 : vector<24x128xf32>
    %17 = arith.divf %15, %16 : vector<24x128xf32>
    %18 = arith.mulf %17, %0 : vector<24x128xf32>
    %c0_12 = arith.constant 0 : index
    %c0_13 = arith.constant 0 : index
    %19 = vector.load %arg6[%c0_12, %c0_13] : memref<24x128xf32, #tpu.memory_space<vmem>>, vector<24x128xf32>
    tpu.vector_store %arg6[%c0_12, %c0_13], %18 {strides = array<i32>} : memref<24x128xf32, #tpu.memory_space<vmem>>, vector<24x128xf32>,
    return
  }
  func.func @transform_0(%arg0: i32) -> (i32, i32) {
    %c0_i32 = arith.constant 0 : i32
    %c0_i32_0 = arith.constant 0 : i32
    return %arg0, %c0_i32 : i32, i32
  }
  func.func @transform_1(%arg0: i32) -> (i32, i32) {
    %c0_i32 = arith.constant 0 : i32
    %c0_i32_0 = arith.constant 0 : i32
    %c0_i32_1 = arith.constant 0 : i32
    return %c0_i32, %c0_i32_0 : i32, i32
  }
  func.func @transform_2(%arg0: i32) -> (i32, i32) {
    %c0_i32 = arith.constant 0 : i32
    %c0_i32_0 = arith.constant 0 : i32
    %c0_i32_1 = arith.constant 0 : i32
    return %c0_i32, %c0_i32_0 : i32, i32
  }
  func.func @transform_3(%arg0: i32) -> (i32, i32) {
    %c0_i32 = arith.constant 0 : i32
    %c0_i32_0 = arith.constant 0 : i32
    %c0_i32_1 = arith.constant 0 : i32
    return %c0_i32, %c0_i32_0 : i32, i32
  }
  func.func @transform_4(%arg0: i32) -> (i32, i32) {
    %c0_i32 = arith.constant 0 : i32
    %c0_i32_0 = arith.constant 0 : i32
    %c0_i32_1 = arith.constant 0 : i32
    return %c0_i32, %c0_i32_0 : i32, i32
  }
  func.func @transform_5(%arg0: i32) -> (i32, i32) {
    %c0_i32 = arith.constant 0 : i32
    %c0_i32_0 = arith.constant 0 : i32
    return %arg0, %c0_i32 : i32, i32
  }
}

</mosaic_0001>

<bundles_post_ra>
// kernel: tpu_custom_call.1
= control target key start
LH: loop header
LB: loop body
LE: loop exit
PB: predicated region body
PF: predicated region fallthrough
CT: control target
= control target key end

     0   :  { %10 = vsyncpa [#allocation3], 0  ;;  %s700_s0 = inlined_call_operand.hbm [shape: f32[24,128], index: 0, kind: input, shape index: {}]   ;;  %s701_s1 = inlined_call_operand.hbm [shape: f32[128,256], index: 1, kind: input, shape index: {}]   ;;  %s702_s2 = inlined_call_operand.vmem [shape: f32[1,256], index: 2, kind: input, shape index: {}]   ;;  %s703_s3 = inlined_call_operand.hbm [shape: f32[256,128], index: 3, kind: input, shape index: {}]   ;;  %s704_s4 = inlined_call_operand.vmem [shape: f32[1,128], index: 4, kind: input, shape index: {}]   ;;  %s705_s5 = inlined_call_operand.hbm [shape: f32[24,128], index: 5, kind: output, shape index: {}]  }
   0x1   :  { %11 = vsyncpa [#allocation6], 0 }
   0x2   :  { %12 = vsyncpa [#allocation4], 0  ;;  %s583_s18 = smov [#allocation5]   ;;  %s489_s22 = scalar_lea.hbm %s701_s1, 4096 }
   0x3   :  { %s30_s19 = sshll.u32 %s583_s18, 4  ;;  %p490_p0 = scmp.ne.s32.totalorder %s701_s1, %s489_s22  ;;  %s31_s19 = int_to_ptr.vmem [resolvable:$true] %s30_s19 }
   0x4   :  { %p493_p1 = scmp.lt.u32.totalorder %s489_s22, %s701_s1 }
   0x6   :  { %p495_p2 = pnand %p493_p1, %p490_p0 }
   0x8   :  { %498 = shalt.err (!%p495_p2)
}
   0x9   :  { %s499_s27 = scalar_lea.vmem %s31_s19, 4096  ;;  %p504_p4 = scmp.lt.s32.totalorder %s31_s19, %s31_s19 }
   0xa   :  { %p500_p3 = scmp.ne.s32.totalorder %s31_s19, %s499_s27  ;;  %p505_p5 = scmp.lt.s32.totalorder %s499_s27, %s499_s27 }
   0xc   :  { %p506_p6 = por %p505_p5, %p504_p4 }
   0xe   :  { %p507_p7 = pnand %p506_p6, %p500_p3 }
  0x10   :  { %510 = shalt.err (!%p507_p7)
}
  0x11   :  { %s584_s28 = smov 256   ;;  %s585_s29 = smov 16  }
  0x12   :  { %36 = dma.hbm_to_vmem [thread:$0]  %s701_s1, 4096, %s31_s19, [#allocation6], %s584_s28, %s584_s28, %s585_s29  }
  0x13   :  { %s586_s7 = smov [#allocation2]   ;;  %s511_s11 = scalar_lea.hbm %s700_s0, 384 }
  0x14   :  { %s18_s8 = sshll.u32 %s586_s7, 4  ;;  %p512_p8 = scmp.ne.s32.totalorder %s700_s0, %s511_s11  ;;  %s19_s8 = int_to_ptr.vmem [resolvable:$true] %s18_s8 }
  0x15   :  { %p515_p9 = scmp.lt.u32.totalorder %s511_s11, %s700_s0 }
  0x17   :  { %p517_p10 = pnand %p515_p9, %p512_p8 }
  0x19   :  { %520 = shalt.err (!%p517_p10)
}
  0x1a   :  { %s521_s16 = scalar_lea.vmem %s19_s8, 384  ;;  %p526_p12 = scmp.lt.s32.totalorder %s19_s8, %s19_s8 }
  0x1b   :  { %p522_p11 = scmp.ne.s32.totalorder %s19_s8, %s521_s16  ;;  %p527_p13 = scmp.lt.s32.totalorder %s521_s16, %s521_s16 }
  0x1d   :  { %p528_p0 = por %p527_p13, %p526_p12 }
  0x1f   :  { %p529_p1 = pnand %p528_p0, %p522_p11 }
  0x21   :  { %532 = shalt.err (!%p529_p1)
}
  0x22   :  { %s587_s1 = smov 128   ;;  %s588_s17 = smov 8  }
  0x23   :  { %24 = dma.hbm_to_vmem [thread:$0]  %s700_s0, 384, %s19_s8, [#allocation3], %s587_s1, %s587_s1, %s588_s17  }
  0x24   :  { %s589_s20 = smov [#allocation7]   ;;  %s533_s24 = scalar_lea.hbm %s703_s3, 4096 }
  0x25   :  { %s44_s21 = sshll.u32 %s589_s20, 4  ;;  %p534_p2 = scmp.ne.s32.totalorder %s703_s3, %s533_s24  ;;  %s45_s21 = int_to_ptr.vmem [resolvable:$true] %s44_s21 }
  0x26   :  { %p537_p3 = scmp.lt.u32.totalorder %s533_s24, %s703_s3 }
  0x28   :  { %p539_p4 = pnand %p537_p3, %p534_p2 }
  0x2a   :  { %542 = shalt.err (!%p539_p4)
}
  0x2b   :  { %s543_s29 = scalar_lea.vmem %s45_s21, 4096  ;;  %p548_p6 = scmp.lt.s32.totalorder %s45_s21, %s45_s21 }
  0x2c   :  { %p544_p5 = scmp.ne.s32.totalorder %s45_s21, %s543_s29  ;;  %p549_p7 = scmp.lt.s32.totalorder %s543_s29, %s543_s29 }
  0x2e   :  { %p550_p8 = por %p549_p7, %p548_p6 }
  0x30   :  { %p551_p9 = pnand %p550_p8, %p544_p5 }
  0x32   :  { %554 = shalt.err (!%p551_p9)
}
  0x33   :  { %50 = dma.hbm_to_vmem [thread:$0]  %s703_s3, 4096, %s45_s21, [#allocation6], %s587_s1, %s587_s1, %s588_s17  }
  0x34   :  { %577 = dma.done.wait [#allocation3], 384  }
  0x35   :  { %578 = vsyncadd [#allocation3], 4294966912 }
  0x36   :  { %579 = dma.done.wait [#allocation6], 8192  }
  0x37   :  { %580 = vsyncadd [#allocation6], 4294959104  ;;  %v590_v0 = vmov 0.0   ;;  %v66_v1 = vld [vmem:[#allocation5 + $0x8] sm:$0xff]  ;;  %v68_v2 = vld [vmem:[#allocation5 + $0x18] sm:$0xff] }
  0x38   :  { %173 = vmatprep.mubr.f32.mxu0 %v590_v0  ;;  %v65_v3 = vld [vmem:[#allocation5] sm:$0xff]  ;;  %v404_v4 = vpack.c.bf16 %v68_v2, %v66_v1  ;;  %v67_v5 = vld [vmem:[#allocation5 + $0x10] sm:$0xff]  ;;  %v70_v6 = vld [vmem:[#allocation5 + $0x28] sm:$0xff] }
  0x39   :  { %v72_v7 = vld [vmem:[#allocation5 + $0x38] sm:$0xff]  ;;  %v406_v8 = vpack.c.bf16 %v67_v5, %v65_v3  ;;  %v69_v10 = vld [vmem:[#allocation5 + $0x20] sm:$0xff]  ;;  %v71_v11 = vld [vmem:[#allocation5 + $0x30] sm:$0xff] }
  0x3a   :  { %v408_v9 = vpack.c.bf16 %v72_v7, %v70_v6  ;;  %v74_v12 = vld [vmem:[#allocation5 + $0x48] sm:$0xff]  ;;  %405 = vmatprep.subr.bf16.mxu0 %v404_v4  ;;  %v76_v13 = vld [vmem:[#allocation5 + $0x58] sm:$0xff]  ;;  %v410_v14 = vpack.c.bf16 %v71_v11, %v69_v10  ;;  %v73_v16 = vld [vmem:[#allocation5 + $0x40] sm:$0xff] }
  0x3b   :  { %407 = vmatpush1.bf16.msra.mxu0 %v406_v8  ;;  %v412_v15 = vpack.c.bf16 %v76_v13, %v74_v12  ;;  %v75_v17 = vld [vmem:[#allocation5 + $0x50] sm:$0xff]  ;;  %v78_v18 = vld [vmem:[#allocation5 + $0x68] sm:$0xff]  ;;  %v80_v19 = vld [vmem:[#allocation5 + $0x78] sm:$0xff] }
  0x3c   :  { %409 = vmatprep.subr.bf16.mxu0 %v408_v9  ;;  %v414_v20 = vpack.c.bf16 %v75_v17, %v73_v16  ;;  %v416_v21 = vpack.c.bf16 %v80_v19, %v78_v18  ;;  %v77_v22 = vld [vmem:[#allocation5 + $0x60] sm:$0xff]  ;;  %v79_v23 = vld [vmem:[#allocation5 + $0x70] sm:$0xff]  ;;  %v82_v24 = vld [vmem:[#allocation5 + $0x88] sm:$0xff] }
  0x3d   :  { %v84_v25 = vld [vmem:[#allocation5 + $0x98] sm:$0xff]  ;;  %v81_v26 = vld [vmem:[#allocation5 + $0x80] sm:$0xff]  ;;  %v83_v27 = vld [vmem:[#allocation5 + $0x90] sm:$0xff]  ;;  %v418_v29 = vpack.c.bf16 %v79_v23, %v77_v22 }
  0x3e   :  { %v214_v28 = vld [vmem:[#allocation7 + $0x80] sm:$0xff]  ;;  %v86_v30 = vld [vmem:[#allocation5 + $0xa8] sm:$0xff]  ;;  %v88_v31 = vld [vmem:[#allocation5 + $0xb8] sm:$0xff]  ;;  %v420_v35 = vpack.c.bf16 %v84_v25, %v82_v24  ;;  %v422_v45 = vpack.c.bf16 %v83_v27, %v81_v26 }
  0x3f   :  { %411 = vmatpush1.bf16.msra.mxu0 %v410_v14  ;;  %v215_v32 = vld [vmem:[#allocation7 + $0x88] sm:$0xff]  ;;  %v198_v33 = vld [vmem:[#allocation7] sm:$0xff]  ;;  %v216_v38 = vld [vmem:[#allocation7 + $0x90] sm:$0xff]  ;;  %v424_v49 = vpack.c.bf16 %v88_v31, %v86_v30 }
  0x40   :  { %413 = vmatprep.subr.bf16.mxu0 %v412_v15  ;;  %v199_v34 = vld [vmem:[#allocation7 + $0x8] sm:$0xff]  ;;  %v436_v36 = vpack.c.bf16 %v215_v32, %v214_v28  ;;  %v217_v39 = vld [vmem:[#allocation7 + $0x98] sm:$0xff]  ;;  %v200_v40 = vld [vmem:[#allocation7 + $0x10] sm:$0xff] }
  0x41   :  { %v438_v37 = vpack.c.bf16 %v199_v34, %v198_v33  ;;  %v440_v41 = vpack.c.bf16 %v217_v39, %v216_v38  ;;  %v201_v42 = vld [vmem:[#allocation7 + $0x18] sm:$0xff]  ;;  %v218_v43 = vld [vmem:[#allocation7 + $0xa0] sm:$0xff]  ;;  %v219_v44 = vld [vmem:[#allocation7 + $0xa8] sm:$0xff] }
  0x42   :  { %437 = vmatprep.subr.bf16.mxu1 %v436_v36  ;;  %v85_v46 = vld [vmem:[#allocation5 + $0xa0] sm:$0xff]  ;;  %v87_v47 = vld [vmem:[#allocation5 + $0xb0] sm:$0xff]  ;;  %v442_v48 = vpack.c.bf16 %v201_v42, %v200_v40  ;;  %v90_v50 = vld [vmem:[#allocation5 + $0xc8] sm:$0xff]  ;;  %v444_v51 = vpack.c.bf16 %v219_v44, %v218_v43 }
  0x43   :  { %415 = vmatpush1.bf16.msra.mxu0 %v414_v20  ;;  %439 = vmatpush3.bf16.msra.mxu1 %v438_v37  ;;  %v202_v52 = vld [vmem:[#allocation7 + $0x20] sm:$0xff]  ;;  %v203_v53 = vld [vmem:[#allocation7 + $0x28] sm:$0xff]  ;;  %v92_v54 = vld [vmem:[#allocation5 + $0xd8] sm:$0xff]  ;;  %v426_v57 = vpack.c.bf16 %v87_v47, %v85_v46  ;;  %v99_v37 = vlaneseq }
  0x44   :  { %417 = vmatprep.subr.bf16.mxu0 %v416_v21  ;;  %441 = vmatprep.subr.bf16.mxu1 %v440_v41  ;;  %v220_v55 = vld [vmem:[#allocation7 + $0xb0] sm:$0xff]  ;;  %v221_v56 = vld [vmem:[#allocation7 + $0xb8] sm:$0xff]  ;;  %v89_v58 = vld [vmem:[#allocation5 + $0xc0] sm:$0xff]  ;;  %v446_v60 = vpack.c.bf16 %v203_v53, %v202_v52  ;;  %v428_v61 = vpack.c.bf16 %v92_v54, %v90_v50 }
  0x45   :  { %v91_v59 = vld [vmem:[#allocation5 + $0xd0] sm:$0xff]  ;;  %v94_v62 = vld [vmem:[#allocation5 + $0xe8] sm:$0xff]  ;;  %v448_v63 = vpack.c.bf16 %v221_v56, %v220_v55  ;;  %v205_v2 = vld [vmem:[#allocation7 + $0x38] sm:$0xff]  ;;  %v100_v38 = vshrl.u32 %v99_v37, 7 }
  0x46   :  { %v204_v1 = vld [vmem:[#allocation7 + $0x30] sm:$0xff]  ;;  %v96_v3 = vld [vmem:[#allocation5 + $0xf8] sm:$0xff]  ;;  %v222_v4 = vld [vmem:[#allocation7 + $0xc0] sm:$0xff]  ;;  %v430_v6 = vpack.c.bf16 %v91_v59, %v89_v58 }
  0x47   :  { %419 = vmatpush1.bf16.msra.mxu0 %v418_v29  ;;  %443 = vmatpush3.bf16.msra.mxu1 %v442_v48  ;;  %v223_v5 = vld [vmem:[#allocation7 + $0xc8] sm:$0xff]  ;;  %v93_v7 = vld [vmem:[#allocation5 + $0xe0] sm:$0xff]  ;;  %v450_v8 = vpack.c.bf16 %v205_v2, %v204_v1  ;;  %v432_v9 = vpack.c.bf16 %v96_v3, %v94_v62  ;;  %v95_v10 = vld [vmem:[#allocation5 + $0xf0] sm:$0xff]  ;;  %v101_v39 = vsub.s32 0, %v100_v38  ;;  %v105_v40 = vsub.s32 1, %v100_v38 }
  0x48   :  { %421 = vmatprep.subr.bf16.mxu0 %v420_v35  ;;  %445 = vmatprep.subr.bf16.mxu1 %v444_v51  ;;  %v452_v11 = vpack.c.bf16 %v223_v5, %v222_v4  ;;  %v206_v12 = vld [vmem:[#allocation7 + $0x40] sm:$0xff]  ;;  %v207_v13 = vld [vmem:[#allocation7 + $0x48] sm:$0xff]  ;;  %v224_v14 = vld [vmem:[#allocation7 + $0xd0] sm:$0xff]  ;;  %v434_v16 = vpack.c.bf16 %v95_v10, %v93_v7 }
  0x49   :  { %v225_v15 = vld [vmem:[#allocation7 + $0xd8] sm:$0xff]  ;;  %v454_v17 = vpack.c.bf16 %v207_v13, %v206_v12  ;;  %v208_v19 = vld [vmem:[#allocation7 + $0x50] sm:$0xff]  ;;  %v226_v21 = vld [vmem:[#allocation7 + $0xe0] sm:$0xff] }
  0x4a   :  { %v456_v18 = vpack.c.bf16 %v225_v15, %v224_v14  ;;  %v209_v20 = vld [vmem:[#allocation7 + $0x58] sm:$0xff]  ;;  %v227_v22 = vld [vmem:[#allocation7 + $0xe8] sm:$0xff]  ;;  %v669_v26 = vld [vmem:[#allocation2 + $0x8] sm:$0xff] }
  0x4b   :  { %423 = vmatpush1.bf16.msra.mxu0 %v422_v45  ;;  %447 = vmatpush3.bf16.msra.mxu1 %v446_v60  ;;  %v665_v23 = vld [vmem:[#allocation2] sm:$0xff]  ;;  %v458_v24 = vpack.c.bf16 %v209_v20, %v208_v19  ;;  %v460_v25 = vpack.c.bf16 %v227_v22, %v226_v21  ;;  %v673_v27 = vld [vmem:[#allocation2 + $0x10] sm:$0xff]  ;;  %v210_v28 = vld [vmem:[#allocation7 + $0x60] sm:$0xff] }
  0x4c   :  { %425 = vmatprep.subr.bf16.mxu0 %v424_v49  ;;  %449 = vmatprep.subr.bf16.mxu1 %v448_v63  ;;  %v211_v29 = vld [vmem:[#allocation7 + $0x68] sm:$0xff]  ;;  %v228_v31 = vld [vmem:[#allocation7 + $0xf0] sm:$0xff]  ;;  %v229_v32 = vld [vmem:[#allocation7 + $0xf8] sm:$0xff] }
  0x4d   :  { %v462_v30 = vpack.c.bf16 %v211_v29, %v210_v28  ;;  %v464_v33 = vpack.c.bf16 %v229_v32, %v228_v31  ;;  %v212_v34 = vld [vmem:[#allocation7 + $0x70] sm:$0xff]  ;;  %v213_v35 = vld [vmem:[#allocation7 + $0x78] sm:$0xff]  ;;  %v359_v62 = vld [vmem:[%s704_s4] ss:$0 sm:$0xff]  ;;  %s591_s4 = smov [#allocation8]  }
  0x4e   :  { %v466_v36 = vpack.c.bf16 %v213_v35, %v212_v34  ;;  %s346_s8 = sshll.u32 %s591_s4, 4  ;;  %s347_s8 = int_to_ptr.vmem [resolvable:$true] %s346_s8 }
  0x4f   :  { %427 = vmatpush1.bf16.msra.mxu0 %v426_v57  ;;  %451 = vmatpush3.bf16.msra.mxu1 %v450_v8  ;;  %s555_s9 = scalar_lea.vmem %s347_s8, 384  ;;  %p560_p11 = scmp.lt.s32.totalorder %s347_s8, %s347_s8 }
  0x50   :  { %429 = vmatprep.subr.bf16.mxu0 %v428_v61  ;;  %453 = vmatprep.subr.bf16.mxu1 %v452_v11  ;;  %p556_p10 = scmp.ne.s32.totalorder %s347_s8, %s555_s9  ;;  %p561_p12 = scmp.lt.s32.totalorder %s555_s9, %s555_s9 }
  0x52   :  { %p562_p13 = por %p561_p12, %p560_p11 }
  0x53   :  { %431 = vmatpush1.bf16.msra.mxu0 %v430_v6  ;;  %455 = vmatpush3.bf16.msra.mxu1 %v454_v17 }
  0x54   :  { %433 = vmatprep.subr.bf16.mxu0 %v432_v9  ;;  %457 = vmatprep.subr.bf16.mxu1 %v456_v18  ;;  %p563_p0 = pnand %p562_p13, %p556_p10 }
  0x57   :  { %435 = vmatpush1.bf16.msra.mxu0 %v434_v16  ;;  %459 = vmatpush3.bf16.msra.mxu1 %v458_v24 }
  0x58   :  { %461 = vmatprep.subr.bf16.mxu1 %v460_v25 }
  0x5a   :  { %174 = vmatmul.mubr.f32.vlgmr.msra.gmra.mrb[0].mxu0 %v665_v23 }
  0x5b   :  { %179 = vmatprep.mubr.f32.mxu0 %v590_v0  ;;  %463 = vmatpush3.bf16.msra.mxu1 %v462_v30 }
  0x5c   :  { %465 = vmatprep.subr.bf16.mxu1 %v464_v33 }
  0x5e   :  { %180 = vmatmul.mubr.f32.gmra.mrb[2].mxu0 %v669_v26 }
  0x5f   :  { %185 = vmatprep.mubr.f32.mxu0 %v590_v0  ;;  %467 = vmatpush3.bf16.msra.mxu1 %v466_v36  ;;  %v97_v0 = vld [vmem:[%s702_s2] sm:$0x3] }
  0x60   :  { %v102_v41 = vrot.slane %v97_v0, %v101_v39  ;;  %v106_v42 = vrot.slane %v97_v0, %v105_v40 }
  0x62   :  { %186 = vmatmul.mubr.f32.gmra.mrb[4].mxu0 %v673_v27 }
 0x12d   :  { %v175_v43 = vpop.f32.mrb[0].mxu0 }
 0x12e   :  { %v176_v44 = vadd.f32 %v175_v43, %v102_v41  ;;  %v177_v45 = vpop.f32.mrb[1].mxu0 }
 0x12f   :  { %v178_v46 = vadd.f32 %v177_v45, %v106_v42 }
 0x130   :  { %v192_v49 = vmax.f32 %v176_v44, 0.0 }
 0x131   :  { %v181_v47 = vpop.f32.mrb[2].mxu0  ;;  %v193_v48 = vmax.f32 %v178_v46, 0.0 }
 0x132   :  { %v182_v50 = vadd.f32 %v181_v47, %v102_v41  ;;  %v183_v51 = vpop.f32.mrb[3].mxu0 }
 0x133   :  { %v184_v52 = vadd.f32 %v183_v51, %v106_v42  ;;  %301 = vmatprep.mubr.f32.mxu1 %v193_v48 }
 0x134   :  { %302 = vmatmul.mubr.f32.vlgmr.msra.gmra.mrb[0].mxu1 %v192_v49  ;;  %v194_v55 = vmax.f32 %v182_v50, 0.0 }
 0x135   :  { %v195_v53 = vmax.f32 %v184_v52, 0.0  ;;  %v187_v54 = vpop.f32.mrb[4].mxu0 }
 0x136   :  { %v188_v56 = vadd.f32 %v187_v54, %v102_v41  ;;  %v189_v57 = vpop.f32.mrb[5].mxu0 }
 0x137   :  { %v190_v58 = vadd.f32 %v189_v57, %v106_v42  ;;  %306 = vmatprep.mubr.f32.mxu1 %v195_v53 }
 0x138   :  { %307 = vmatmul.mubr.f32.gmra.mrb[2].mxu1 %v194_v55  ;;  %v196_v60 = vmax.f32 %v188_v56, 0.0 }
 0x139   :  { %v197_v59 = vmax.f32 %v190_v58, 0.0 }
 0x13b   :  { %311 = vmatprep.mubr.f32.mxu1 %v197_v59 }
 0x13c   :  { %312 = vmatmul.mubr.f32.gmra.mrb[4].mxu1 %v196_v60 }
 0x207   :  { %v395_v61 = vpop.f32.mrb[0].mxu1 }
 0x208   :  { %v396_v63 = vpop.f32.mrb[1].mxu1 }
 0x209   :  { %v397_v1 = vadd.f32 %v396_v63, %v395_v61 }
 0x20b   :  { %v304_v2 = vadd.f32 %v397_v1, %v359_v62  ;;  %v398_v3 = vpop.f32.mrb[2].mxu1 }
 0x20c   :  { %v399_v4 = vpop.f32.mrb[3].mxu1 }
 0x20d   :  { %v360_v5 = vmul.f32 -1.442695, %v304_v2  ;;  %v400_v6 = vadd.f32 %v399_v4, %v398_v3 }
 0x20f   :  { %477 = vpow2.f32 %v360_v5  ;;  %v309_v7 = vadd.f32 %v400_v6, %v359_v62  ;;  %v401_v8 = vpop.f32.mrb[4].mxu1 }
 0x210   :  { %v402_v9 = vpop.f32.mrb[5].mxu1 }
 0x211   :  { %v361_v10 = vmul.f32 -1.442695, %v309_v7  ;;  %v403_v11 = vadd.f32 %v402_v9, %v401_v8 }
 0x213   :  { %479 = vpow2.f32 %v361_v10  ;;  %v314_v12 = vadd.f32 %v403_v11, %v359_v62 }
 0x215   :  { %v362_v13 = vmul.f32 -1.442695, %v314_v12 }
 0x217   :  { %481 = vpow2.f32 %v362_v13 }
 0x219   :  { %v478_v14 = vpop.eup %477 }
 0x21a   :  { %v326_v15 = vadd.f32 1.0, %v478_v14 }
 0x21c   :  { %483 = vrcp.f32 %v326_v15 }
 0x21d   :  { %v480_v16 = vpop.eup %479 }
 0x21e   :  { %v327_v17 = vadd.f32 1.0, %v480_v16 }
 0x220   :  { %485 = vrcp.f32 %v327_v17 }
 0x221   :  { %v482_v18 = vpop.eup %481 }
 0x222   :  { %v328_v19 = vadd.f32 1.0, %v482_v18 }
 0x224   :  { %487 = vrcp.f32 %v328_v19 }
 0x226   :  { %v484_v20 = vpop.eup %483 }
 0x227   :  { %v335_v21 = vmul.f32 %v484_v20, %v665_v23 }
 0x229   :  { %338 = vst [vmem:[#allocation8] sm:$0xff] %v335_v21 }
 0x22a   :  { %v486_v22 = vpop.eup %485 }
 0x22b   :  { %v336_v24 = vmul.f32 %v486_v22, %v669_v26 }
 0x22d   :  { %339 = vst [vmem:[#allocation8 + $0x8] sm:$0xff] %v336_v24 }
 0x22e   :  { %v488_v25 = vpop.eup %487 }
 0x22f   :  { %v337_v28 = vmul.f32 %v488_v25, %v673_v27 }
 0x231   :  { %340 = vst [vmem:[#allocation8 + $0x10] sm:$0xff] %v337_v28 }
 0x232   :  { %566 = shalt.err (!%p563_p0)
}
 0x233   :  { %s567_s12 = scalar_lea.hbm %s705_s5, 384 }
 0x234   :  { %p568_p1 = scmp.ne.s32.totalorder %s705_s5, %s567_s12  ;;  %p571_p2 = scmp.lt.u32.totalorder %s567_s12, %s705_s5 }
 0x236   :  { %p573_p3 = pnand %p571_p2, %p568_p1 }
 0x238   :  { %576 = shalt.err (!%p573_p3)
}
 0x239   :  { %352 = dma.vmem_to_hbm [thread:$0]  %s347_s8, 384, %s705_s5, [#allocation4], %s587_s1, %s587_s1, %s588_s17  }
 0x23a   :  { %581 = dma.done.wait [#allocation4], 384  }
 0x23b   :  { %582 = vsyncadd [#allocation4], 4294966912 }
 0x23c   :  { %356 = vsyncpa [#allocation3], 1 }
 0x23d   :  { %357 = vsyncpa [#allocation6], 1 }
 0x23e   :  { %358 = vsyncpa [#allocation4], 1 }

</bundles_post_ra>
